<compile_context>
chip_gen: v7x
topology: tpu7x:2x2x1
jax: 0.10.0
libtpu: 0.0.40
codegen_flags: <defaults>
</compile_context>

<pallas_src>
import jax
import jax.numpy as jnp
from jax import lax
from jax.experimental import pallas as pl
from jax.experimental.pallas import tpu as pltpu


_LANE = 128
_SUBLANE = 8
# Conservative budget for keeping the whole table VMEM-resident per TensorCore
# (v7x: 64 MiB per TC and, with "parallel" grid sharding, each TC holds a copy).
_TABLE_VMEM_BUDGET = 24 * 1024 * 1024
# Below this vocab size the one-hot + MXU gather beats the row-loop gather.
_ONEHOT_MAX_V = 512


def _round_up(x: int, m: int) -> int:
    return (x + m - 1) // m * m


# ----------------------------------------------------------------------------
# Kernels
# ----------------------------------------------------------------------------

def _gather_onehot_kernel(idx_ref, w_ref, o_ref):
    """Small-V path: exact {0,1} one-hot (VPU) + MXU matmul gather.

    idx_ref: (tile_n, 1) int32 tile of indices (VMEM)
    w_ref:   (V, Dp) pre-scaled table, VMEM-resident (constant index_map)
    o_ref:   (tile_n, Dp) output tile
    """
    tile_n = idx_ref.shape[0]
    v_dim = w_ref.shape[0]
    iota_v = lax.broadcasted_iota(jnp.int32, (tile_n, v_dim), 1)
    one_hot = (iota_v == idx_ref[...]).astype(w_ref.dtype)  # exact 0/1
    o_ref[...] = jnp.dot(one_hot, w_ref[...],
                         preferred_element_type=jnp.float32).astype(o_ref.dtype)


def _gather_loop_kernel(idx_smem_ref, w_ref, o_ref):
    """Larger-V path: per-row dynamic-slice gather from the VMEM-resident table.

    idx_smem_ref: (n_pad,) int32 indices, scalar-prefetched into SMEM
    w_ref:        (V, Dp) pre-scaled table, VMEM-resident (constant index_map)
    o_ref:        (tile_n, Dp) output tile
    """
    tile_n = o_ref.shape[0]
    base = pl.program_id(0) * tile_n

    @pl.loop(0, tile_n)
    def _(t):
        v = idx_smem_ref[base + t]                       # cheap SMEM scalar read
        o_ref[pl.ds(t, 1), :] = w_ref[pl.ds(v, 1), :]    # exact row copy


# ----------------------------------------------------------------------------
# Wrapper
# ----------------------------------------------------------------------------

def scaled_embedding_forward(x, weight, scale: float, *, tile_n: int = 512,
                             gather_impl: str = "auto"):
    """out = weight[x] * scale via a batched Pallas gather kernel.

    gather_impl: "auto" | "onehot" | "loop"
    """
    assert weight.ndim == 2
    V, D = weight.shape
    batch_shape = x.shape

    # Hoist the scale multiply: one O(V*D) XLA op outside the gather kernel.
    w = weight * jnp.asarray(scale, dtype=weight.dtype)

    # Lane-dense output: pad embedding dim up to a multiple of 128 so output
    # stores are full unmasked vregs; padded lanes are sliced off below.
    d_pad = _round_up(max(D, _LANE), _LANE)
    if d_pad != D:
        w = jnp.pad(w, ((0, 0), (0, d_pad - D)))

    table_bytes = V * d_pad * w.dtype.itemsize
    if table_bytes > _TABLE_VMEM_BUDGET:
        # TODO(synk): large-table fallback — keep weight in memory_space=pl.ANY and
        # do double-buffered manual row DMAs driven by the scalar-prefetched indices.
        raise NotImplementedError(
            f"embedding table ({table_bytes} B) exceeds the per-TC VMEM "
            f"residency budget ({_TABLE_VMEM_BUDGET} B)")

    # Indices: flatten, clamp in-bounds (PyTorch would raise on OOB), pad to tiles.
    idx = jnp.clip(x.reshape(-1).astype(jnp.int32), 0, V - 1)
    N = idx.shape[0]

    # Clamp tile to the problem size (keep it sublane-aligned) so tiny problems
    # don't pay for a full 512-row tile of padding.
    tile_n = max(_SUBLANE, _round_up(min(tile_n, N), _SUBLANE))
    num_tiles = pl.cdiv(N, tile_n)
    n_pad = num_tiles * tile_n
    idx_padded = jnp.zeros((n_pad,), jnp.int32).at[:N].set(idx)

    if gather_impl == "auto":
        gather_impl = "onehot" if V <= _ONEHOT_MAX_V else "loop"

    out_shape = jax.ShapeDtypeStruct((n_pad, d_pad), w.dtype)
    itemsize = w.dtype.itemsize
    bytes_accessed = table_bytes + n_pad * 4 + n_pad * d_pad * itemsize

    # Whole table resident in VMEM with a constant index_map; single-buffered.
    def _table_spec(index_map):
        return pl.BlockSpec((V, d_pad), index_map, pipeline_mode=pl.Buffered(1))

    if gather_impl == "onehot":
        onehot_bytes = tile_n * V * 4
        vmem_needed = (table_bytes + 2 * tile_n * 4
                       + 2 * tile_n * d_pad * itemsize + onehot_bytes)
        grid_spec = pltpu.PrefetchScalarGridSpec(
            num_scalar_prefetch=0,
            grid=(num_tiles,),
            in_specs=[
                pl.BlockSpec((tile_n, 1), lambda i: (i, 0)),
                _table_spec(lambda i: (0, 0)),
            ],
            out_specs=pl.BlockSpec((tile_n, d_pad), lambda i: (i, 0)),
        )
        cost = pl.CostEstimate(flops=2 * n_pad * V * d_pad, transcendentals=0,
                               bytes_accessed=bytes_accessed)
        kernel = _gather_onehot_kernel
        args = (idx_padded.reshape(n_pad, 1), w)
    elif gather_impl == "loop":
        vmem_needed = table_bytes + 2 * tile_n * d_pad * itemsize
        grid_spec = pltpu.PrefetchScalarGridSpec(
            num_scalar_prefetch=1,   # indices land in SMEM, drive the row loop
            grid=(num_tiles,),
            in_specs=[_table_spec(lambda i, idx_s: (0, 0))],
            out_specs=pl.BlockSpec((tile_n, d_pad), lambda i, idx_s: (i, 0)),
        )
        cost = pl.CostEstimate(flops=n_pad * d_pad, transcendentals=0,
                               bytes_accessed=bytes_accessed)
        kernel = _gather_loop_kernel
        args = (idx_padded, w)
    else:
        raise ValueError(f"unknown gather_impl: {gather_impl!r}")

    vmem_limit = int(min(max(2 * vmem_needed + (4 << 20), 32 << 20), 56 << 20))

    out_flat = pl.pallas_call(
        kernel,
        out_shape=out_shape,
        grid_spec=grid_spec,
        compiler_params=pltpu.CompilerParams(
            dimension_semantics=("parallel",),
            vmem_limit_bytes=vmem_limit,
        ),
        cost_estimate=cost,
    )(*args)

    return out_flat[:N, :D].reshape(*batch_shape, D)


def init_scaled_embedding(key, num_embeddings: int, embedding_dim: int,
                          scale: float = 10.0, smooth: bool = False):
    """Mirror ScaledEmbedding.__init__ (nn.Embedding default init = N(0,1))."""
    weight = jax.random.normal(key, (num_embeddings, embedding_dim), jnp.float32)
    if smooth:
        weight = jnp.cumsum(weight, axis=0)
        weight = weight / jnp.sqrt(
            jnp.arange(1, num_embeddings + 1, dtype=weight.dtype))[:, None]
    weight = weight / scale  # stored weight is divided by scale in __init__
    return weight


if __name__ == "__main__":
    key = jax.random.PRNGKey(0)
    k_w, k_x = jax.random.split(key)

    num_embeddings = 16
    embedding_dim = 32        # < 128: exercises the lane-padding path
    scale = 10.0
    B, T = 2, 8

    weight = init_scaled_embedding(k_w, num_embeddings, embedding_dim,
                                   scale=scale, smooth=False)
    x = jax.random.randint(k_x, (B, T), 0, num_embeddings, dtype=jnp.int32)

    # Pure-JAX reference.
    ref = jnp.take(weight, x, axis=0) * scale

    # Small-V (one-hot + MXU) path.
    out_onehot = scaled_embedding_forward(x, weight, scale, gather_impl="onehot")
    out_onehot = jax.block_until_ready(out_onehot)
    assert out_onehot.shape == (B, T, embedding_dim)
    assert jnp.allclose(out_onehot, ref, atol=1e-5, rtol=1e-5)

    # Large-V (SMEM-prefetched indices + row-loop gather) path — exact.
    out_loop = scaled_embedding_forward(x, weight, scale, gather_impl="loop")
    out_loop = jax.block_until_ready(out_loop)
    assert out_loop.shape == (B, T, embedding_dim)
    assert jnp.allclose(out_loop, ref, atol=1e-6, rtol=1e-6)

    print("KERNEL_OK")
</pallas_src>

<mosaic_0001>
module attributes {stable_mosaic.version = 11 : i64} {
  func.func @_gather_onehot_kernel(%arg0: i32, %arg1: memref<16x1xi32, #tpu.memory_space<vmem>>, %arg2: memref<16x128xf32, #tpu.memory_space<vmem>>, %arg3: memref<16x128xf32, #tpu.memory_space<vmem>>) attributes {dimension_semantics = [#tpu.dimension_semantics<parallel>], iteration_bounds = array<i64: 1>, scalar_prefetch = 0 : i64, scratch_operands = 0 : i64, tpu.core_type = #tpu.core_type<tc>, window_params = [{transform_indices = @transform_0, window_bounds = array<i64: 16, 1>}, {pipeline_mode = #tpu.pipeline_mode<synchronous>, transform_indices = @transform_1, window_bounds = array<i64: 16, 128>}, {transform_indices = @transform_2, window_bounds = array<i64: 16, 128>}]} {
    %0 = tpu.iota {dimensions = array<i32: 1>} : vector<16x16xi32>
    %c0 = arith.constant 0 : index
    %c0_0 = arith.constant 0 : index
    %1 = vector.load %arg1[%c0, %c0_0] : memref<16x1xi32, #tpu.memory_space<vmem>>, vector<16x1xi32>
    %2 = vector.broadcast %1 : vector<16x1xi32> to vector<16x16xi32>
    %3 = arith.cmpi eq, %0, %2 : vector<16x16xi32>
    %4 = arith.extui %3 : vector<16x16xi1> to vector<16x16xi32>
    %5 = arith.sitofp %4 : vector<16x16xi32> to vector<16x16xf32>
    %c0_1 = arith.constant 0 : index
    %c0_2 = arith.constant 0 : index
    %6 = vector.load %arg2[%c0_1, %c0_2] : memref<16x128xf32, #tpu.memory_space<vmem>>, vector<16x128xf32>
    %cst = arith.constant dense<0.000000e+00> : vector<16x128xf32>
    %7 = tpu.matmul %5, %6, %cst {dimension_numbers = #tpu.dot_dimension_numbers<[1], [0], [0], [1], [0, 0, 1, 1], [], []>} : vector<16x16xf32>, vector<16x128xf32>, vector<16x128xf32> -> vector<16x128xf32>
    %c0_3 = arith.constant 0 : index
    %c0_4 = arith.constant 0 : index
    %8 = vector.load %arg3[%c0_3, %c0_4] : memref<16x128xf32, #tpu.memory_space<vmem>>, vector<16x128xf32>
    tpu.vector_store %arg3[%c0_3, %c0_4], %7 {strides = array<i32>} : memref<16x128xf32, #tpu.memory_space<vmem>>, vector<16x128xf32>,
    return
  }
  func.func @transform_0(%arg0: i32) -> (i32, i32) {
    %c0_i32 = arith.constant 0 : i32
    %c0_i32_0 = arith.constant 0 : i32
    return %arg0, %c0_i32 : i32, i32
  }
  func.func @transform_1(%arg0: i32) -> (i32, i32) {
    %c0_i32 = arith.constant 0 : i32
    %c0_i32_0 = arith.constant 0 : i32
    %c0_i32_1 = arith.constant 0 : i32
    return %c0_i32, %c0_i32_0 : i32, i32
  }
  func.func @transform_2(%arg0: i32) -> (i32, i32) {
    %c0_i32 = arith.constant 0 : i32
    %c0_i32_0 = arith.constant 0 : i32
    return %arg0, %c0_i32 : i32, i32
  }
}

</mosaic_0001>

<bundles_post_ra>
// kernel: tpu_custom_call.1
= control target key start
LH: loop header
LB: loop body
LE: loop exit
PB: predicated region body
PF: predicated region fallthrough
CT: control target
= control target key end

     0   :  { %s223_s0 = inlined_call_operand.vmem [shape: s32[16,1], index: 0, kind: input, shape index: {}]   ;;  %s224_s1 = inlined_call_operand.vmem [shape: f32[16,128], index: 1, kind: input, shape index: {}]   ;;  %s225_s2 = inlined_call_operand.hbm [shape: f32[16,128], index: 2, kind: output, shape index: {}]  }
   0x1   :  { %v14_v0 = vld [vmem:[%s223_s0] sm:$0xff] }
   0x2   :  { %7 = vsyncpa [#allocation3], 0  ;;  %v179_v1 = vmov 0   ;;  %v28_v2 = vld [vmem:[%s224_s1] sm:$0xff]  ;;  %v29_v3 = vld [vmem:[%s224_s1 + $0x8] sm:$0xff]  ;;  %v12_v6 = vlaneseq  ;;  %vm30_vm0 = vcmask 130048  }
   0x3   :  { %154 = vset.pattern.permute.xlu0 %v179_v1  ;;  %v145_v4 = vpack.c.bf16 %v29_v3, %v28_v2  ;;  %v15_v5 = vld [vmem:[%s223_s0 + $0x8] sm:$0xff]  ;;  %v180_v9 = vmov 0.0   ;;  %s181_s1 = smov [#allocation2]  }
   0x4   :  { %17 = vperm.xlu0 %154, %v14_v0   ;;  %v13_v7 = vand.u32 127, %v12_v6  ;;  %s119_s17 = sshll.u32 %s181_s1, 4  ;;  %s120_s17 = int_to_ptr.vmem [resolvable:$true] %s119_s17 }
   0x5   :  { %146 = vmatprep.subr.bf16.mxu0 %v145_v4  ;;  %s155_s0 = scalar_lea.vmem %s120_s17, 256  ;;  %p160_p1 = scmp.lt.s32.totalorder %s120_s17, %s120_s17 }
   0x6   :  { %148 = vmatpush3.bf16.msra.mxu0 %v145_v4  ;;  %p156_p0 = scmp.ne.s32.totalorder %s120_s17, %s155_s0  ;;  %p161_p2 = scmp.lt.s32.totalorder %s155_s0, %s155_s0 }
   0x8   :  { %20 = vperm.xlu0 %154, %v15_v5   ;;  %p162_p3 = por %p161_p2, %p160_p1 }
   0xa   :  { %p163_p4 = pnand %p162_p3, %p156_p0 }
  0x83   :  { %v18_v8 = vpop.permute.xlu0 %17 }
  0x84   :  { %vm22_vm1 = vcmp.eq.s32.totalorder %v13_v7, %v18_v8 }
  0x85   :  { %v130_v10 = vsel %vm22_vm1, 1.0, %v180_v9 }
  0x86   :  { %142 = vmatprep.mubr.msk.f32.mxu0 %vm30_vm0, %v130_v10 }
  0x87   :  { %v21_v11 = vpop.permute.xlu0 %20 }
  0x88   :  { %vm23_vm2 = vcmp.eq.s32.totalorder %v13_v7, %v21_v11 }
  0x89   :  { %v131_v12 = vsel %vm23_vm2, 1.0, %v180_v9 }
  0x8a   :  { %143 = vmatmul.mubr.msk.f32.vlgmr.msra.gmra.mrb[0].mxu0 %vm30_vm0, %v131_v12 }
 0x15d   :  { %v144_v13 = vpop.f32.mrb[0].mxu0 }
 0x15e   :  { %113 = vst [vmem:[#allocation2 + $0x8] sm:$0xff] %v144_v13  ;;  %v103_v14 = vpop.f32.mrb[1].mxu0 }
 0x15f   :  { %112 = vst [vmem:[#allocation2] sm:$0xff] %v103_v14 }
 0x160   :  { %166 = shalt.err (!%p163_p4)
}
 0x161   :  { %s167_s20 = scalar_lea.hbm %s225_s2, 256 }
 0x162   :  { %p168_p5 = scmp.ne.s32.totalorder %s225_s2, %s167_s20  ;;  %p171_p6 = scmp.lt.u32.totalorder %s167_s20, %s225_s2 }
 0x164   :  { %p173_p7 = pnand %p171_p6, %p168_p5 }
 0x166   :  { %176 = shalt.err (!%p173_p7)
}
 0x167   :  { %s182_s25 = smov 128   ;;  %s183_s26 = smov 8  }
 0x168   :  { %125 = dma.vmem_to_hbm [thread:$0]  %s120_s17, 256, %s225_s2, [#allocation3], %s182_s25, %s182_s25, %s183_s26  }
 0x169   :  { %177 = dma.done.wait [#allocation3], 256  }
 0x16a   :  { %178 = vsyncadd [#allocation3], 4294967040 }
 0x16b   :  { %129 = vsyncpa [#allocation3], 1 }

</bundles_post_ra>
